<compile_context>
chip_gen: v6e
topology: v6e:2x2x1
jax: 0.10.0
libtpu: 0.0.40
codegen_flags: <defaults>
</compile_context>

<pallas_src>
import math
import numpy as np
import jax
import jax.numpy as jnp
from jax.experimental import pallas as pl
from jax.experimental.pallas import tpu as pltpu

EPS = 1e-5


def _fused_bn_relu_deconv_kernel(x_ref, xh_ref, scale_ref, shift_ref, w_ref,
                                 o_ref, act_ref):
    """One (batch sample, row tile) grid step.

    x_ref     : (TR, W+1, Cin)   f32   raw rows [r*TR, r*TR+TR), one zero pad column on the right
    xh_ref    : (W+1, Cin)       f32   raw halo row (r+1)*TR (clamped; nulled on the last tile)
    scale_ref : (W+1, Cin)       f32   BN scale per (column, channel); column W is 0
    shift_ref : (W+1, Cin)       f32   BN shift per (column, channel); column W is 0
    w_ref     : (4*Cin, 4*Cout)  mm    packed deconv RHS, K = [tap00|tap01|tap10|tap11] x Cin,
                                       output columns ordered [ph, pw, oc]
    o_ref     : (R_t, GS*4*Cout) f32   lane-packed sub-pixel output rows for this tile
    act_ref   : (TR+1, W+1, Cin) mm    VMEM scratch: BN+ReLU activations (+ halo row)
    """
    tr, wp1, cin = x_ref.shape
    w_sp = wp1 - 1
    c4 = w_ref.shape[1]
    r_t, lanes = o_ref.shape
    gs = lanes // c4

    scale = scale_ref[...]
    shift = shift_ref[...]

    # --- BatchNorm (folded affine, f32) + ReLU, written once into the VMEM scratch ---
    a_main = jnp.maximum(x_ref[...] * scale + shift, 0.0)             # (TR, W+1, Cin)
    act_ref[pl.ds(0, tr), :, :] = a_main.astype(act_ref.dtype)

    # Halo row: on the last row tile there is no row below, so zero its affine ->
    # ReLU(0*x + 0) == 0 (no full-row select needed).
    keep = jnp.where(pl.program_id(1) == pl.num_programs(1) - 1, 0.0, 1.0)
    a_halo = jnp.maximum(xh_ref[...] * (scale * keep) + shift * keep, 0.0)   # (W+1, Cin)
    act_ref[pl.ds(tr, 1), :, :] = a_halo[None].astype(act_ref.dtype)

    # --- Single MXU matmul: K = 4 taps x Cin, N = 4*Cout packed sub-pixel columns ---
    def tap(di, dj):   # activation at (i+di, j+dj), rows flattened (ref-slice load, no concat)
        return act_ref[pl.ds(di, tr), pl.ds(dj, w_sp), :].reshape(tr * w_sp, cin)

    lhs = jnp.concatenate([tap(0, 0), tap(0, 1), tap(1, 0), tap(1, 1)], axis=1)  # (TR*W, 4*Cin)
    acc = jnp.dot(lhs, w_ref[...], preferred_element_type=jnp.float32)           # (TR*W, 4*Cout)

    # --- Lane-dense packing: fold GS contiguous row-chunks into the lane dimension so the
    #     store uses >=128 dense lanes instead of 4*Cout-wide masked stores. ---
    if gs > 1:
        acc = jnp.concatenate([acc[s * r_t:(s + 1) * r_t, :] for s in range(gs)], axis=1)
    o_ref[...] = acc.astype(o_ref.dtype)


def _pick_tiling(H, W, Cin, Cout, N, in_itemsize, vmem_cap_bytes):
    """Row tile TR (divisor of H) and lane-packing group GS."""
    c4 = 4 * Cout
    gs = 128 // math.gcd(c4, 128)          # smallest GS with GS*c4 a multiple of 128
    if (H * W) % gs != 0:
        gs = 1

    # Bigger input blocks on 128 MiB parts (v5e/v6e), capped on 64 MiB v7x.
    target = (7 << 20) if vmem_cap_bytes >= (96 << 20) else (3 << 20)
    hard_cap = max(target, vmem_cap_bytes // 8)
    row_bytes = (W + 1) * Cin * in_itemsize

    divs = [d for d in range(1, H + 1) if H % d == 0]
    ok = [d for d in divs if (d * W) % (8 * gs) == 0 or d == H]
    fit = [d for d in ok if d * row_bytes <= target]
    if not fit:
        fit = [d for d in ok if d * row_bytes <= hard_cap] or [min(ok)]

    # Soft preference: >= 4 total grid steps so both v7x TensorCores are fed for small N.
    min_tiles = max(1, -(-4 // N))
    pref = [d for d in fit if H // d >= min_tiles]
    tr = max(pref) if pref else max(fit)

    if (tr * W) % gs != 0:
        gs = 1
    return tr, gs


def densenet_transition_up(x_nchw, gamma, beta, w, *, use_bf16_matmul=True):
    """Forward pass of DenseNetTransitionUp.

    x_nchw: (N, Cin, H, W) float32
    gamma, beta: (Cin,) BatchNorm affine params
    w: (Cin, Cout, 3, 3) ConvTranspose2d weight (PyTorch layout)
    returns: (N, Cout, 2H, 2W) float32
    """
    N, Cin, H, W = x_nchw.shape
    Cout = w.shape[1]
    C4 = 4 * Cout
    x32 = x_nchw.astype(jnp.float32)

    # --- BatchNorm batch statistics (cheap global reduction -> plain JAX), folded to an affine.
    nhw = N * H * W
    s1 = jnp.sum(x32, axis=(0, 2, 3))
    s2 = jnp.sum(x32 * x32, axis=(0, 2, 3))
    mean = s1 / nhw
    var = jnp.maximum(s2 / nhw - mean * mean, 0.0)      # biased, like torch BN batch stats
    inv = jax.lax.rsqrt(var + EPS)
    g32 = gamma.astype(jnp.float32)
    scale = g32 * inv
    shift = beta.astype(jnp.float32) - mean * scale

    # Column-tiled affine of width W+1 with the pad column zeroed: ReLU(0*x+0)=0 kills the pad
    # column inside the kernel for free (no iota/mask pass).
    col_keep = (jnp.arange(W + 1) < W).astype(jnp.float32)[:, None]     # (W+1, 1)
    scale_w = col_keep * scale[None, :]                                  # (W+1, Cin)
    shift_w = col_keep * shift[None, :]

    # --- Single packed deconv RHS: K rows = [tap00|tap01|tap10|tap11] x Cin,
    #     output columns = [ph, pw, oc]; zero blocks where a tap does not contribute. ---
    w32 = w.astype(jnp.float32)
    z = jnp.zeros((Cin, Cout), jnp.float32)
    wk = lambda kh, kw: w32[:, :, kh, kw]
    w_packed = jnp.concatenate([
        jnp.concatenate([wk(1, 1), wk(1, 2), wk(2, 1), wk(2, 2)], axis=1),  # tap (i  , j  )
        jnp.concatenate([z,        wk(1, 0), z,        wk(2, 0)], axis=1),  # tap (i  , j+1)
        jnp.concatenate([z,        z,        wk(0, 1), wk(0, 2)], axis=1),  # tap (i+1, j  )
        jnp.concatenate([z,        z,        z,        wk(0, 0)], axis=1),  # tap (i+1, j+1)
    ], axis=0)                                                              # (4*Cin, 4*Cout)

    mm_dtype = jnp.bfloat16 if use_bf16_matmul else jnp.float32
    mm_isz = 2 if use_bf16_matmul else 4
    w_packed = w_packed.astype(mm_dtype)

    # Channels-last input with one zero pad column. x stays f32 in HBM (BN affine in f32);
    # only the post-BN activations / weights are bf16 MXU operands.
    x_nhwc = jnp.transpose(x32, (0, 2, 3, 1))
    x_p = jnp.pad(x_nhwc, ((0, 0), (0, 0), (0, 1), (0, 0)))                # (N, H, W+1, Cin)

    try:
        vmem_cap = int(getattr(pltpu.get_tpu_info(), "vmem_capacity_bytes", 64 << 20))
    except Exception:
        vmem_cap = 64 << 20

    TR, GS = _pick_tiling(H, W, Cin, Cout, N, 4, vmem_cap)
    n_tiles = H // TR
    R_t = TR * W // GS
    lanes = GS * C4

    # VMEM budget derived from actual block sizes (double-buffered) + scratch + headroom.
    blk_bytes = (TR * (W + 1) * Cin * 4          # main input block (f32)
                 + (W + 1) * Cin * 4             # halo row
                 + 2 * (W + 1) * Cin * 4         # scale / shift
                 + 4 * Cin * C4 * mm_isz         # packed weights
                 + R_t * lanes * 4)              # output block
    scratch_bytes = (TR + 1) * (W + 1) * Cin * mm_isz
    vmem_limit = int(min(max(2 * blk_bytes + scratch_bytes + (8 << 20), 16 << 20),
                         max(vmem_cap - (8 << 20), 16 << 20)))

    out = pl.pallas_call(
        _fused_bn_relu_deconv_kernel,
        out_shape=jax.ShapeDtypeStruct((N, H * W // GS, lanes), jnp.float32),
        grid_spec=pltpu.PrefetchScalarGridSpec(
            num_scalar_prefetch=0,
            grid=(N, n_tiles),
            in_specs=[
                # main rows of this tile
                pl.BlockSpec((None, TR, W + 1, Cin), lambda n, r: (n, r, 0, 0)),
                # one-row halo: thin second view of the same array (clamped row index;
                # its affine is zeroed in-kernel on the last tile)
                pl.BlockSpec((None, None, W + 1, Cin),
                             lambda n, r: (n, jnp.minimum((r + 1) * TR, H - 1), 0, 0)),
                pl.BlockSpec((W + 1, Cin), lambda n, r: (0, 0)),
                pl.BlockSpec((W + 1, Cin), lambda n, r: (0, 0)),
                pl.BlockSpec((4 * Cin, C4), lambda n, r: (0, 0)),
            ],
            out_specs=pl.BlockSpec((None, R_t, lanes), lambda n, r: (n, r, 0)),
            scratch_shapes=[pltpu.VMEM((TR + 1, W + 1, Cin), mm_dtype)],
        ),
        compiler_params=pltpu.CompilerParams(
            dimension_semantics=("parallel", "parallel"),
            vmem_limit_bytes=vmem_limit,
        ),
    )(x_p, x_p, scale_w, shift_w, w_packed)

    # --- Epilogue (outside the kernel, fuses into one transpose-copy):
    #     undo the lane packing, then the sub-pixel interleave, then back to NCHW. ---
    y = out.reshape(N, n_tiles, R_t, GS, C4)
    y = jnp.transpose(y, (0, 1, 3, 2, 4)).reshape(N, H, W, 2, 2, Cout)      # (n, i, j, ph, pw, oc)
    y = jnp.transpose(y, (0, 1, 3, 2, 4, 5)).reshape(N, 2 * H, 2 * W, Cout)
    return jnp.transpose(y, (0, 3, 1, 2))


def reference(x, gamma, beta, w):
    """Plain-JAX reference matching the PyTorch module (validation only)."""
    mean = x.mean(axis=(0, 2, 3), keepdims=True)
    var = x.var(axis=(0, 2, 3), keepdims=True)  # biased
    a = (x - mean) / jnp.sqrt(var + EPS) * gamma.reshape(1, -1, 1, 1) \
        + beta.reshape(1, -1, 1, 1)
    a = jnp.maximum(a, 0.0)
    # ConvTranspose2d == dilated conv with spatially-flipped, (in/out)-swapped kernel.
    wk = jnp.transpose(jnp.flip(w, axis=(2, 3)), (1, 0, 2, 3))  # (Cout, Cin, 3, 3)
    return jax.lax.conv_general_dilated(
        a, wk, window_strides=(1, 1), padding=((1, 2), (1, 2)),
        lhs_dilation=(2, 2), rhs_dilation=(1, 1),
        dimension_numbers=("NCHW", "OIHW", "NCHW"))


if __name__ == "__main__":
    # Module config: c_in=40, compression_factor=0.1 -> c_out=4
    N, C_IN, H, W = 2, 40, 8, 8
    C_OUT = int(0.1 * C_IN)

    key = jax.random.PRNGKey(0)
    kx, kg, kb, kw = jax.random.split(key, 4)
    x = jax.random.normal(kx, (N, C_IN, H, W), jnp.float32)
    gamma = 1.0 + 0.1 * jax.random.normal(kg, (C_IN,), jnp.float32)
    beta = 0.1 * jax.random.normal(kb, (C_IN,), jnp.float32)
    # kaiming-normal-style init for the ConvTranspose2d weight (Cin, Cout, 3, 3)
    w = jax.random.normal(kw, (C_IN, C_OUT, 3, 3), jnp.float32) * math.sqrt(2.0 / (C_OUT * 9))

    fwd = jax.jit(densenet_transition_up)
    y = jax.block_until_ready(fwd(x, gamma, beta, w))
    assert y.shape == (N, C_OUT, 2 * H, 2 * W), y.shape

    y_ref = jax.block_until_ready(reference(x, gamma, beta, w))
    # bf16 MXU operands (f32 accumulate, f32 BN affine) -> slightly looser tolerance than pure f32.
    np.testing.assert_allclose(np.asarray(y), np.asarray(y_ref), rtol=2e-2, atol=2e-2)

    print("KERNEL_OK")
</pallas_src>

<mosaic_0001>
module attributes {stable_mosaic.version = 11 : i64} {
  func.func @_fused_bn_relu_deconv_kernel(%arg0: i32, %arg1: i32, %arg2: memref<1x8x9x40xf32, #tpu.memory_space<vmem>>, %arg3: memref<1x1x9x40xf32, #tpu.memory_space<vmem>>, %arg4: memref<9x40xf32, #tpu.memory_space<vmem>>, %arg5: memref<9x40xf32, #tpu.memory_space<vmem>>, %arg6: memref<160x16xbf16, #tpu.memory_space<vmem>>, %arg7: memref<1x8x128xf32, #tpu.memory_space<vmem>>, %arg8: memref<9x9x40xbf16, #tpu.memory_space<vmem>>) attributes {dimension_semantics = [#tpu.dimension_semantics<parallel>, #tpu.dimension_semantics<parallel>], iteration_bounds = array<i64: 2, 1>, scalar_prefetch = 0 : i64, scratch_operands = 1 : i64, tpu.core_type = #tpu.core_type<tc>, window_params = [{transform_indices = @transform_0, window_bounds = array<i64: 1, 8, 9, 40>}, {transform_indices = @transform_1, window_bounds = array<i64: 1, 1, 9, 40>}, {pipeline_mode = #tpu.pipeline_mode<synchronous>, transform_indices = @transform_2, window_bounds = array<i64: 9, 40>}, {pipeline_mode = #tpu.pipeline_mode<synchronous>, transform_indices = @transform_3, window_bounds = array<i64: 9, 40>}, {pipeline_mode = #tpu.pipeline_mode<synchronous>, transform_indices = @transform_4, window_bounds = array<i64: 160, 16>}, {transform_indices = @transform_5, window_bounds = array<i64: 1, 8, 128>}]} {
    %c0 = arith.constant 0 : index
    %c0_0 = arith.constant 0 : index
    %0 = vector.load %arg4[%c0, %c0_0] : memref<9x40xf32, #tpu.memory_space<vmem>>, vector<9x40xf32>
    %c0_1 = arith.constant 0 : index
    %c0_2 = arith.constant 0 : index
    %1 = vector.load %arg5[%c0_1, %c0_2] : memref<9x40xf32, #tpu.memory_space<vmem>>, vector<9x40xf32>
    %c0_3 = arith.constant 0 : index
    %c0_4 = arith.constant 0 : index
    %c0_5 = arith.constant 0 : index
    %c0_6 = arith.constant 0 : index
    %2 = vector.load %arg2[%c0_3, %c0_4, %c0_5, %c0_6] : memref<1x8x9x40xf32, #tpu.memory_space<vmem>>, vector<1x8x9x40xf32>
    %3 = vector.shape_cast %2 : vector<1x8x9x40xf32> to vector<8x9x40xf32>
    %4 = vector.shape_cast %0 : vector<9x40xf32> to vector<1x9x40xf32>
    %5 = vector.broadcast %4 : vector<1x9x40xf32> to vector<8x9x40xf32>
    %6 = arith.mulf %3, %5 : vector<8x9x40xf32>
    %7 = vector.shape_cast %1 : vector<9x40xf32> to vector<1x9x40xf32>
    %8 = vector.broadcast %7 : vector<1x9x40xf32> to vector<8x9x40xf32>
    %9 = arith.addf %6, %8 : vector<8x9x40xf32>
    %cst = arith.constant 0.000000e+00 : f32
    %10 = vector.broadcast %cst : f32 to vector<8x9x40xf32>
    %11 = arith.maximumf %9, %10 : vector<8x9x40xf32>
    %12 = arith.truncf %11 : vector<8x9x40xf32> to vector<8x9x40xbf16>
    %c0_7 = arith.constant 0 : index
    %c0_8 = arith.constant 0 : index
    %c0_9 = arith.constant 0 : index
    %13 = vector.load %arg8[%c0_7, %c0_8, %c0_9] : memref<9x9x40xbf16, #tpu.memory_space<vmem>>, vector<8x9x40xbf16>
    tpu.vector_store %arg8[%c0_7, %c0_8, %c0_9], %12 {strides = array<i32>} : memref<9x9x40xbf16, #tpu.memory_space<vmem>>, vector<8x9x40xbf16>,
    %c0_i32 = arith.constant 0 : i32
    %14 = arith.cmpi eq, %arg1, %c0_i32 : i32
    %cst_10 = arith.constant 0.000000e+00 : f32
    %cst_11 = arith.constant 1.000000e+00 : f32
    %15 = arith.select %14, %cst_10, %cst_11 : f32
    %c0_12 = arith.constant 0 : index
    %c0_13 = arith.constant 0 : index
    %c0_14 = arith.constant 0 : index
    %c0_15 = arith.constant 0 : index
    %16 = vector.load %arg3[%c0_12, %c0_13, %c0_14, %c0_15] : memref<1x1x9x40xf32, #tpu.memory_space<vmem>>, vector<1x1x9x40xf32>
    %17 = vector.shape_cast %16 : vector<1x1x9x40xf32> to vector<9x40xf32>
    %18 = vector.broadcast %15 : f32 to vector<9x40xf32>
    %19 = arith.mulf %0, %18 : vector<9x40xf32>
    %20 = arith.mulf %17, %19 : vector<9x40xf32>
    %21 = vector.broadcast %15 : f32 to vector<9x40xf32>
    %22 = arith.mulf %1, %21 : vector<9x40xf32>
    %23 = arith.addf %20, %22 : vector<9x40xf32>
    %cst_16 = arith.constant 0.000000e+00 : f32
    %24 = vector.broadcast %cst_16 : f32 to vector<9x40xf32>
    %25 = arith.maximumf %23, %24 : vector<9x40xf32>
    %26 = vector.shape_cast %25 : vector<9x40xf32> to vector<1x9x40xf32>
    %27 = arith.truncf %26 : vector<1x9x40xf32> to vector<1x9x40xbf16>
    %c8 = arith.constant 8 : index
    %c0_17 = arith.constant 0 : index
    %c0_18 = arith.constant 0 : index
    %28 = vector.load %arg8[%c8, %c0_17, %c0_18] : memref<9x9x40xbf16, #tpu.memory_space<vmem>>, vector<1x9x40xbf16>
    tpu.vector_store %arg8[%c8, %c0_17, %c0_18], %27 {strides = array<i32>} : memref<9x9x40xbf16, #tpu.memory_space<vmem>>, vector<1x9x40xbf16>,
    %c0_19 = arith.constant 0 : index
    %c0_20 = arith.constant 0 : index
    %c0_21 = arith.constant 0 : index
    %29 = vector.load %arg8[%c0_19, %c0_20, %c0_21] : memref<9x9x40xbf16, #tpu.memory_space<vmem>>, vector<8x8x40xbf16>
    %30 = vector.shape_cast %29 : vector<8x8x40xbf16> to vector<64x40xbf16>
    %c0_22 = arith.constant 0 : index
    %c1 = arith.constant 1 : index
    %c0_23 = arith.constant 0 : index
    %31 = vector.load %arg8[%c0_22, %c1, %c0_23] : memref<9x9x40xbf16, #tpu.memory_space<vmem>>, vector<8x8x40xbf16>
    %32 = vector.shape_cast %31 : vector<8x8x40xbf16> to vector<64x40xbf16>
    %c1_24 = arith.constant 1 : index
    %c0_25 = arith.constant 0 : index
    %c0_26 = arith.constant 0 : index
    %33 = vector.load %arg8[%c1_24, %c0_25, %c0_26] : memref<9x9x40xbf16, #tpu.memory_space<vmem>>, vector<8x8x40xbf16>
    %34 = vector.shape_cast %33 : vector<8x8x40xbf16> to vector<64x40xbf16>
    %c1_27 = arith.constant 1 : index
    %c1_28 = arith.constant 1 : index
    %c0_29 = arith.constant 0 : index
    %35 = vector.load %arg8[%c1_27, %c1_28, %c0_29] : memref<9x9x40xbf16, #tpu.memory_space<vmem>>, vector<8x8x40xbf16>
    %36 = vector.shape_cast %35 : vector<8x8x40xbf16> to vector<64x40xbf16>
    %37 = tpu.concatenate %30, %32, %34, %36 in 1 : vector<64x40xbf16>, vector<64x40xbf16>, vector<64x40xbf16>, vector<64x40xbf16> -> vector<64x160xbf16>
    %c0_30 = arith.constant 0 : index
    %c0_31 = arith.constant 0 : index
    %38 = vector.load %arg6[%c0_30, %c0_31] : memref<160x16xbf16, #tpu.memory_space<vmem>>, vector<160x16xbf16>
    %cst_32 = arith.constant dense<0.000000e+00> : vector<64x16xf32>
    %39 = tpu.matmul %37, %38, %cst_32 {dimension_numbers = #tpu.dot_dimension_numbers<[1], [0], [0], [1], [0, 0, 1, 1], [], []>} : vector<64x160xbf16>, vector<160x16xbf16>, vector<64x16xf32> -> vector<64x16xf32>
    %40 = vector.extract_strided_slice %39 {offsets = [0, 0], sizes = [8, 16], strides = [1, 1]} : vector<64x16xf32> to vector<8x16xf32>
    %41 = vector.extract_strided_slice %39 {offsets = [8, 0], sizes = [8, 16], strides = [1, 1]} : vector<64x16xf32> to vector<8x16xf32>
    %42 = vector.extract_strided_slice %39 {offsets = [16, 0], sizes = [8, 16], strides = [1, 1]} : vector<64x16xf32> to vector<8x16xf32>
    %43 = vector.extract_strided_slice %39 {offsets = [24, 0], sizes = [8, 16], strides = [1, 1]} : vector<64x16xf32> to vector<8x16xf32>
    %44 = vector.extract_strided_slice %39 {offsets = [32, 0], sizes = [8, 16], strides = [1, 1]} : vector<64x16xf32> to vector<8x16xf32>
    %45 = vector.extract_strided_slice %39 {offsets = [40, 0], sizes = [8, 16], strides = [1, 1]} : vector<64x16xf32> to vector<8x16xf32>
    %46 = vector.extract_strided_slice %39 {offsets = [48, 0], sizes = [8, 16], strides = [1, 1]} : vector<64x16xf32> to vector<8x16xf32>
    %47 = vector.extract_strided_slice %39 {offsets = [56, 0], sizes = [8, 16], strides = [1, 1]} : vector<64x16xf32> to vector<8x16xf32>
    %48 = tpu.concatenate %40, %41, %42, %43, %44, %45, %46, %47 in 1 : vector<8x16xf32>, vector<8x16xf32>, vector<8x16xf32>, vector<8x16xf32>, vector<8x16xf32>, vector<8x16xf32>, vector<8x16xf32>, vector<8x16xf32> -> vector<8x128xf32>
    %c0_33 = arith.constant 0 : index
    %c0_34 = arith.constant 0 : index
    %c0_35 = arith.constant 0 : index
    %49 = vector.load %arg7[%c0_33, %c0_34, %c0_35] : memref<1x8x128xf32, #tpu.memory_space<vmem>>, vector<1x8x128xf32>
    %50 = vector.shape_cast %49 : vector<1x8x128xf32> to vector<8x128xf32>
    %51 = vector.shape_cast %48 : vector<8x128xf32> to vector<1x8x128xf32>
    tpu.vector_store %arg7[%c0_33, %c0_34, %c0_35], %51 {strides = array<i32>} : memref<1x8x128xf32, #tpu.memory_space<vmem>>, vector<1x8x128xf32>,
    return
  }
  func.func @transform_0(%arg0: i32, %arg1: i32) -> (i32, i32, i32, i32) {
    %c0_i32 = arith.constant 0 : i32
    %c0_i32_0 = arith.constant 0 : i32
    %c0_i32_1 = arith.constant 0 : i32
    return %arg0, %arg1, %c0_i32, %c0_i32_0 : i32, i32, i32, i32
  }
  func.func @transform_1(%arg0: i32, %arg1: i32) -> (i32, i32, i32, i32) {
    %c1_i32 = arith.constant 1 : i32
    %0 = arith.addi %arg1, %c1_i32 : i32
    %c8_i32 = arith.constant 8 : i32
    %1 = arith.muli %0, %c8_i32 : i32
    %c7_i32 = arith.constant 7 : i32
    %2 = arith.minsi %1, %c7_i32 : i32
    %c0_i32 = arith.constant 0 : i32
    %c0_i32_0 = arith.constant 0 : i32
    %c0_i32_1 = arith.constant 0 : i32
    return %arg0, %2, %c0_i32, %c0_i32_0 : i32, i32, i32, i32
  }
  func.func @transform_2(%arg0: i32, %arg1: i32) -> (i32, i32) {
    %c0_i32 = arith.constant 0 : i32
    %c0_i32_0 = arith.constant 0 : i32
    %c0_i32_1 = arith.constant 0 : i32
    return %c0_i32, %c0_i32_0 : i32, i32
  }
  func.func @transform_3(%arg0: i32, %arg1: i32) -> (i32, i32) {
    %c0_i32 = arith.constant 0 : i32
    %c0_i32_0 = arith.constant 0 : i32
    %c0_i32_1 = arith.constant 0 : i32
    return %c0_i32, %c0_i32_0 : i32, i32
  }
  func.func @transform_4(%arg0: i32, %arg1: i32) -> (i32, i32) {
    %c0_i32 = arith.constant 0 : i32
    %c0_i32_0 = arith.constant 0 : i32
    %c0_i32_1 = arith.constant 0 : i32
    return %c0_i32, %c0_i32_0 : i32, i32
  }
  func.func @transform_5(%arg0: i32, %arg1: i32) -> (i32, i32, i32) {
    %c0_i32 = arith.constant 0 : i32
    %c0_i32_0 = arith.constant 0 : i32
    return %arg0, %arg1, %c0_i32 : i32, i32, i32
  }
}

</mosaic_0001>

<bundles_post_ra>
// kernel: densenet_transition_up.1
= control target key start
LH: loop header
LB: loop body
LE: loop exit
PB: predicated region body
PF: predicated region fallthrough
CT: control target
= control target key end

     0   :  { %s1414_s18 = smov 0   ;;  %s1416_s19 = smov 0   ;;  %s1826_s0 = inlined_call_operand.vmem [shape: f32[2,8,9,40], index: 0, kind: input, shape index: {}, may-alias: {0,1}]   ;;  %s1827_s1 = inlined_call_operand.vmem [shape: f32[2,8,9,40], index: 1, kind: input, shape index: {}, may-alias: {0,1}]   ;;  %s1828_s2 = inlined_call_operand.vmem [shape: f32[9,40], index: 2, kind: input, shape index: {}]   ;;  %s1829_s3 = inlined_call_operand.vmem [shape: f32[9,40], index: 3, kind: input, shape index: {}]   ;;  %s1830_s4 = inlined_call_operand.vmem [shape: bf16[160,16], index: 4, kind: input, shape index: {}]   ;;  %s1831_s5 = inlined_call_operand.vmem [shape: f32[2,8,128], index: 5, kind: output, shape index: {}]  }
   0x1   :  { %s1418_s20 = smov 0  }
   0x2 LB: > { %s27_s21 = sadd.s32 1, %s1368_s19  ;;  %p1204_p0 = scmp.ge.s32.totalorder %s1372_s20, 1  ;;  %s1372_s20 = sphi %s1418_s20, %s15_s20   ;;  %s1368_s19 = sphi %s1416_s19, %s1837_s19   ;;  %s1364_s18 = sphi %s1414_s18, %s1836_s18  }
   0x3   : > { %p29_p1 = scmp.ge.s32.totalorder %s27_s21, 2  ;;  %p241_p2 = scmp.lt.s32.totalorder %s1372_s20, 3 }
   0x5   : > { %s1839_s21 = smov (%p29_p1, %s27_s21), 0  ;;  %p242_p3 = pnand %p1204_p0, %p241_p2 }
   0x6   : > { %p290_p4 = scmp.lt.s32.totalorder (!%p242_p3), %s1364_s18, 1  ;;  %s1375_s25 = smov (!%p242_p3), 80  }
   0x7   : > { %245 = sbr.rel (%p242_p3) target bundleno = 516 (0x204), region = 40  ;;  %s1376_s7 = smov (!%p242_p3), 120  }
   0x8   : > { %s1377_s12 = smov (!%p242_p3), 40   ;;  %s1378_s15 = smov (!%p242_p3), 16  }
   0x9   : > { %s1380_s17 = smov (!%p242_p3), 32   ;;  %s1382_s23 = smov (!%p242_p3), 96  }
   0xa   : > { %s1383_s24 = smov (!%p242_p3), 112  }
   0xc   : > { %s1841_s18 = smov (!%p290_p4, %s1364_s18), 1  ;;  %v1438_v0 = vld [vmem:[%s1828_s2] sm:$0xff]  ;;  %vm457_vm0 = vcmask 322560   ;;  %v1455_v2 = vld [vmem:[%s1828_s2 + $0x8] sm:$0x1]  ;;  %vm459_vm2 = vcmask 319488  }
   0xd   : > { %s1260_s22 = sshll.u32 %s1841_s18, 7  ;;  %v1443_v1 = vld [vmem:[%s1829_s3] sm:$0xff]  ;;  %v1460_v3 = vld [vmem:[%s1829_s3 + $0x8] sm:$0x1]  ;;  %vm460_vm1 = vsmask.f32 256 }
   0xe   : > { %s1450_s29 = scalar_lea.vmem %s1826_s0, %s1260_s22  ;;  %v1466_v7 = vmul.f32 0.0, %v1438_v0  ;;  %v1469_v8 = vmul.f32 0.0, %v1455_v2  ;;  %v1483_v20 = vmul.f32 0.0, %v1443_v1  ;;  %v1374_v21 = vmov 0   ;;  %vm1498_vm3 = vmand %vm459_vm2, %vm460_vm1  ;;  %v466_v35 = vld [vmem:[#allocation2 + $0xc] sm:$0x1] }
   0xf   : > { %v335_v4 = vld [vmem:[%s1450_s29 + $0x30] sm:$0xff]  ;;  %v337_v5 = vld [vmem:[%s1450_s29 + $0x40] sm:$0xff]  ;;  %v332_v13 = vld [vmem:[%s1450_s29 + $0x18] sm:$0x1]  ;;  %993 = vmatprep.subr.bf16.mxu0 %v1374_v21  ;;  %1282 = vmatprep.subr.bf16.mxu1 %v1374_v21  ;;  %s1506_s9 = sadd.s32 112, %s1260_s22  ;;  %vm984_vm7 = vcmask 261120  }
  0x10   : > { %v331_v6 = vld [vmem:[%s1450_s29 + $0x10] sm:$0xff]  ;;  %v351_v9 = vmul.f32 %v335_v4, %v1438_v0  ;;  %v353_v10 = vmul.f32 %v337_v5, %v1438_v0  ;;  %v333_v11 = vld [vmem:[%s1450_s29 + $0x20] sm:$0xff]  ;;  %v334_v14 = vld [vmem:[%s1450_s29 + $0x28] sm:$0x1]  ;;  %v348_v16 = vmul.f32 %v332_v13, %v1455_v2  ;;  %s1544_s16 = scalar_lea.vmem %s1827_s1, %s1506_s9  ;;  %vm537_vm4 = vsmask.f32 3328 }
  0x11   : > { %v347_v12 = vmul.f32 %v331_v6, %v1438_v0  ;;  %v349_v15 = vmul.f32 %v333_v11, %v1438_v0  ;;  %v350_v17 = vmul.f32 %v334_v14, %v1455_v2  ;;  %v329_v18 = vld [vmem:[%s1450_s29] sm:$0xff]  ;;  %v330_v19 = vld [vmem:[%s1450_s29 + $0x8] sm:$0x1]  ;;  %v470_v36 = vld [vmem:[#allocation2 + $0x14] sm:$0x1]  ;;  %vm869_vm8 = vcmask 326656  }
  0x12   : > { %v367_v22 = vadd.f32 %v351_v9, %v1443_v1  ;;  %v369_v23 = vadd.f32 %v353_v10, %v1443_v1  ;;  %v345_v25 = vmul.f32 %v329_v18, %v1438_v0  ;;  %v364_v27 = vadd.f32 %v348_v16, %v1460_v3  ;;  %v338_v30 = vld [vmem:[%s1450_s29 + $0x48] sm:$0x1]  ;;  %v340_v38 = vld [vmem:[%s1450_s29 + $0x58] sm:$0x1]  ;;  %v339_v43 = vld [vmem:[%s1450_s29 + $0x50] sm:$0xff]  ;;  %s1381_s22 = smov 48  }
  0x13   : > { %v363_v24 = vadd.f32 %v347_v12, %v1443_v1  ;;  %v365_v26 = vadd.f32 %v349_v15, %v1443_v1  ;;  %v366_v28 = vadd.f32 %v350_v17, %v1460_v3  ;;  %v346_v29 = vmul.f32 %v330_v19, %v1455_v2  ;;  %v341_v44 = vld [vmem:[%s1450_s29 + $0x60] sm:$0xff]  ;;  %v1340_v45 = vld [vmem:[%s1830_s4 + $0x38] sm:$0xff]   ;;  %v342_v51 = vld [vmem:[%s1450_s29 + $0x68] sm:$0x1] }
  0x14   : > { %v383_v31 = vmax.f32 %v367_v22, 0.0  ;;  %v385_v32 = vmax.f32 %v369_v23, 0.0  ;;  %v361_v37 = vadd.f32 %v345_v25, %v1443_v1  ;;  %v380_v40 = vmax.f32 %v364_v27, 0.0  ;;  %v462_v50 = vld [vmem:[#allocation2 + $0x4] sm:$0x1]  ;;  %v343_v53 = vld [vmem:[%s1450_s29 + $0x70] sm:$0xff]  ;;  %994 = vmatpush1.bf16.msra.mxu0 %v1340_v45  ;;  %1292 = vmatpush1.bf16.msra.mxu1 %v1340_v45 }
  0x15   : > { %v379_v33 = vmax.f32 %v363_v24, 0.0  ;;  %v381_v39 = vmax.f32 %v365_v26, 0.0  ;;  %v382_v41 = vmax.f32 %v366_v28, 0.0  ;;  %v362_v42 = vadd.f32 %v346_v29, %v1460_v3  ;;  %v336_v52 = vld [vmem:[%s1450_s29 + $0x38] sm:$0x1]  ;;  %v1341_v58 = vld [vmem:[%s1830_s4 + $0x30] sm:$0xff]   ;;  %995 = vmatprep.subr.bf16.mxu0 %v1374_v21  ;;  %1283 = vmatprep.subr.bf16.mxu1 %v1374_v21 }
  0x16   : > { %v1269_v46 = vpack.c.bf16 %v383_v31, %v383_v31  ;;  %v1271_v47 = vpack.c.bf16 %v385_v32, %v385_v32  ;;  %v377_v49 = vmax.f32 %v361_v37, 0.0  ;;  %v1266_v55 = vpack.c.bf16 %v380_v40, %v380_v40  ;;  %v344_v13 = vld [vmem:[%s1450_s29 + $0x78] sm:$0x1]  ;;  %v1342_v18 = vld [vmem:[%s1830_s4 + $0x28] sm:$0xff]   ;;  %v495_v27 = vld [vmem:[%s1544_s16] sm:$0xff] }
  0x17   : > { %v1265_v48 = vpack.c.bf16 %v379_v33, %v379_v33  ;;  %v1267_v54 = vpack.c.bf16 %v381_v39, %v381_v39  ;;  %v1268_v56 = vpack.c.bf16 %v382_v41, %v382_v41  ;;  %v378_v57 = vmax.f32 %v362_v42, 0.0  ;;  %v1343_v29 = vld [vmem:[%s1830_s4 + $0x20] sm:$0xff]  }
  0x18   : > { %473 = vst.msk [vmem:[#allocation2 + $0x18] sm:$0xf] %vm457_vm0, %v1269_v46  ;;  %477 = vst.msk [vmem:[#allocation2 + $0x20] sm:$0xf] %vm457_vm0, %v1271_v47  ;;  %v1263_v59 = vpack.c.bf16 %v377_v49, %v377_v49  ;;  %v354_v60 = vmul.f32 %v338_v30, %v1455_v2  ;;  %v355_v61 = vmul.f32 %v339_v43, %v1438_v0  ;;  %vm538_vm5 = vsmask.f32 7440  ;;  %996 = vmatpush1.bf16.msra.mxu0 %v1341_v58 }
  0x19   : > { %465 = vst.msk [vmem:[#allocation2 + $0x8] sm:$0xf] %vm457_vm0, %v1265_v48  ;;  %v356_v62 = vmul.f32 %v340_v38, %v1455_v2  ;;  %469 = vst.msk [vmem:[#allocation2 + $0x10] sm:$0xf] %vm457_vm0, %v1267_v54  ;;  %v467_v63 = vsel %vm1498_vm3, %v1266_v55, %v466_v35  ;;  %v471_v4 = vsel %vm1498_vm3, %v1268_v56, %v470_v36  ;;  %997 = vmatprep.subr.bf16.mxu0 %v1374_v21  ;;  %v496_v46 = vld [vmem:[%s1544_s16 + $0x8] sm:$0x1] }
  0x1a   : > { %v1264_v5 = vpack.c.bf16 %v378_v57, %v378_v57  ;;  %v357_v6 = vmul.f32 %v341_v44, %v1438_v0  ;;  %468 = vst [vmem:[#allocation2 + $0xc] sm:$0x1] %v467_v63  ;;  %472 = vst [vmem:[#allocation2 + $0x14] sm:$0x1] %v471_v4  ;;  %v370_v9 = vadd.f32 %v354_v60, %v1460_v3  ;;  %1293 = vmatpush1.bf16.msra.mxu1 %v1341_v58  ;;  %v478_v60 = vld [vmem:[#allocation2 + $0x24] sm:$0x1] }
  0x1b   : > { %458 = vst.msk [vmem:[#allocation2] sm:$0xf] %vm457_vm0, %v1263_v59  ;;  %v371_v10 = vadd.f32 %v355_v61, %v1443_v1  ;;  %v372_v11 = vadd.f32 %v356_v62, %v1460_v3  ;;  %v358_v12 = vmul.f32 %v342_v51, %v1455_v2  ;;  %v352_v16 = vmul.f32 %v336_v52, %v1455_v2  ;;  %v1344_v52 = vld [vmem:[%s1830_s4 + $0x18] sm:$0xff]   ;;  %vm1617_vm6 = vmor %vm537_vm4, %vm538_vm5  ;;  %s1379_s16 = smov 64  }
  0x1c   : > { %v463_v14 = vsel %vm1498_vm3, %v1264_v5, %v462_v50  ;;  %v373_v15 = vadd.f32 %v357_v6, %v1443_v1  ;;  %v359_v17 = vmul.f32 %v343_v53, %v1438_v0  ;;  %v386_v19 = vmax.f32 %v370_v9, 0.0  ;;  %1284 = vmatprep.subr.bf16.mxu1 %v1374_v21  ;;  %998 = vmatpush1.bf16.msra.mxu0 %v1342_v18 }
  0x1d   : > { %464 = vst [vmem:[#allocation2 + $0x4] sm:$0x1] %v463_v14  ;;  %v387_v22 = vmax.f32 %v371_v10, 0.0  ;;  %v388_v23 = vmax.f32 %v372_v11, 0.0  ;;  %v1555_v24 = vadd.f32 %v358_v12, %v1460_v3  ;;  %v360_v26 = vmul.f32 %v344_v13, %v1455_v2  ;;  %999 = vmatprep.subr.bf16.mxu0 %v1374_v21 }
  0x1e   : > { %v389_v25 = vmax.f32 %v373_v15, 0.0  ;;  %v1562_v28 = vmul.f32 0.0, %v1460_v3  ;;  %v1569_v33 = vpack.c.bf16 %v386_v19, %v386_v19  ;;  %v1572_v2 = vadd.f32 %v352_v16, %v1460_v3  ;;  %1294 = vmatpush1.bf16.msra.mxu1 %v1342_v18  ;;  %v482_v18 = vld [vmem:[#allocation2 + $0x2c] sm:$0x1]  ;;  %v1345_v19 = vld [vmem:[%s1830_s4 + $0x10] sm:$0xff]  }
  0x1f   : > { %v1273_v0 = vpack.c.bf16 %v387_v22, %v387_v22  ;;  %v1567_v30 = vld [vmem:[#allocation2 + $0x18] sm:$0xf]  ;;  %v656_v31 = vld [vmem:[#allocation2 + $0x20] sm:$0xf]  ;;  %v1575_v36 = vadd.f32 %v359_v17, %v1443_v1  ;;  %v1578_v40 = vpack.c.bf16 %v388_v23, %v388_v23  ;;  %v390_v41 = vmax.f32 %v1555_v24, 0.0  ;;  %1285 = vmatprep.subr.bf16.mxu1 %v1374_v21 }
  0x20   : > { %v653_v32 = vld [vmem:[#allocation2 + $0x8] sm:$0xf]  ;;  %v1275_v35 = vpack.c.bf16 %v389_v25, %v389_v25  ;;  %v712_v37 = vshrl.u32 %v656_v31, 16  ;;  %v1237_v38 = vcombine.low %v1567_v30, %v656_v31  ;;  %v654_v39 = vld [vmem:[#allocation2 + $0x10] sm:$0xf]  ;;  %v1585_v45 = vadd.f32 %v360_v26, %v1460_v3  ;;  %1000 = vmatpush1.bf16.msra.mxu0 %v1343_v29 }
  0x21   : > { %481 = vst.msk [vmem:[#allocation2 + $0x28] sm:$0xf] %vm457_vm0, %v1273_v0  ;;  %v684_v42 = vshrl.u32 %v654_v39, 16  ;;  %v687_v43 = vshll.u32 %v654_v39, 16  ;;  %v1236_v44 = vcombine.low %v653_v32, %v654_v39  ;;  %v661_v1 = vld [vmem:[#allocation2 + $0xc] sm:$0x1]  ;;  %v1592_v51 = vmul.f32 %v1466_v7, %v495_v27  ;;  %1001 = vmatprep.subr.bf16.mxu0 %v1374_v21 }
  0x22   : > { %485 = vst.msk [vmem:[#allocation2 + $0x30] sm:$0xf] %vm457_vm0, %v1275_v35  ;;  %v715_v47 = vshll.u32 %v656_v31, 16  ;;  %843 = vrot.lane.b32.xlu1 %v1237_v38, %s1375_s25  ;;  %v698_v48 = vshrl.u32 %v1567_v30, 16  ;;  %v670_v49 = vshrl.u32 %v653_v32, 16  ;;  %v701_v3 = vshll.u32 %v1567_v30, 16  ;;  %1295 = vmatpush1.bf16.msra.mxu1 %v1343_v29 }
  0x23   : > { %v662_v50 = vld [vmem:[#allocation2 + $0x14] sm:$0x1]  ;;  %v686_v53 = vrot.slane %v684_v42, 4  ;;  %v689_v54 = vrot.slane %v687_v43, 5  ;;  %841 = vrot.lane.b32.xlu0 %v1236_v44, %s1375_s25  ;;  %v673_v55 = vshll.u32 %v653_v32, 16  ;;  %v1601_v57 = vrot.slane %v712_v37, 4  ;;  %1286 = vmatprep.subr.bf16.mxu1 %v1374_v21 }
  0x24   : > { %v1599_v56 = vld [vmem:[#allocation2] sm:$0xf]  ;;  %v672_v58 = vrot.slane %v670_v49, 4  ;;  %v679_v59 = vshll.u32 %v661_v1, 16  ;;  %v693_v7 = vshll.u32 %v662_v50, 16  ;;  %v1608_v6 = vmul.f32 %v1469_v8, %v496_v46  ;;  %1002 = vmatpush1.bf16.msra.mxu0 %v1344_v52  ;;  %v1348_v30 = vld [vmem:[%s1830_s4 + $0x48] sm:$0xff]  }
  0x25   : > { %v690_v61 = vor.u32 %v689_v54, %v686_v53  ;;  %v675_v62 = vrot.slane %v673_v55, 5  ;;  %v1604_v63 = vld [vmem:[#allocation2 + $0x8] sm:$0xf]  ;;  %v529_v4 = vld [vmem:[#allocation2 + $0x4] sm:$0x1]  ;;  %v541_v5 = vshrl.u32 %v1599_v56, 16  ;;  %1003 = vmatprep.subr.bf16.mxu0 %v1374_v21  ;;  %v479_v32 = vsel %vm1498_vm3, %v1569_v33, %v478_v60 }
  0x26   : > { %v1611_v9 = vrot.slane %v715_v47, 5  ;;  %v1613_v10 = vrot.slane %v698_v48, 4  ;;  %v695_v12 = vrot.slane %v693_v7, 5  ;;  %v530_v13 = vld [vmem:[#allocation2 + $0xc] sm:$0x1]  ;;  %v544_v14 = vshll.u32 %v1599_v56, 16  ;;  %1296 = vmatpush1.bf16.msra.mxu1 %v1344_v52 }
  0x27   : > { %v691_v15 = vrot.slane %v690_v61, 4  ;;  %v676_v16 = vor.u32 %v675_v62, %v672_v58  ;;  %v681_v8 = vrot.slane %v679_v59, 5  ;;  %v543_v17 = vrot.slane %v541_v5, 4  ;;  %v1627_v27 = vld [vmem:[#allocation2 + $0x20] sm:$0xf]  ;;  %1287 = vmatprep.subr.bf16.mxu1 %v1374_v21  ;;  %v1346_v48 = vld [vmem:[%s1830_s4 + $0x8] sm:$0xff]  }
  0x28   : > { %v546_v22 = vrot.slane %v544_v14, 5  ;;  %v550_v23 = vshll.u32 %v529_v4, 16  ;;  %v555_v25 = vshrl.u32 %v1604_v63, 16  ;;  %v558_v26 = vshll.u32 %v1604_v63, 16  ;;  %v1635_v35 = vld [vmem:[#allocation2 + $0x28] sm:$0xf]  ;;  %1004 = vmatpush1.bf16.msra.mxu0 %v1345_v19 }
  0x29   : > { %v677_v0 = vrot.slane %v676_v16, 4  ;;  %v696_v29 = vsel %vm1617_vm6, %v691_v15, %v695_v12  ;;  %v564_v31 = vshll.u32 %v530_v13, 16  ;;  %480 = vst [vmem:[#allocation2 + $0x24] sm:$0x1] %v479_v32  ;;  %v1638_v43 = vld [vmem:[#allocation2 + $0x28] sm:$0xf]  ;;  %v483_v46 = vsel %vm1498_vm3, %v1578_v40, %v482_v18  ;;  %1005 = vmatprep.subr.bf16.mxu0 %v1374_v21 }
  0x2a   : > { %v547_v37 = vor.u32 %v546_v22, %v543_v17  ;;  %v552_v38 = vrot.slane %v550_v23, 5  ;;  %v557_v39 = vrot.slane %v555_v25, 4  ;;  %v560_v42 = vrot.slane %v558_v26, 5  ;;  %v1646_v47 = vld [vmem:[#allocation2 + $0x30] sm:$0xf]  ;;  %1297 = vmatpush1.bf16.msra.mxu1 %v1345_v19  ;;  %v1347_v13 = vld [vmem:[%s1830_s4] sm:$0xff]  }
  0x2b   : > { %v682_v44 = vsel %vm1617_vm6, %v677_v0, %v681_v8  ;;  %v566_v1 = vrot.slane %v564_v31, 5  ;;  %v597_v33 = vshrl.u32 %v1627_v27, 16  ;;  %484 = vst [vmem:[#allocation2 + $0x2c] sm:$0x1] %v483_v46  ;;  %v600_v53 = vshll.u32 %v1627_v27, 16  ;;  %1288 = vmatprep.subr.bf16.mxu1 %v1374_v21 }
  0x2c   : > { %v1240_v49 = vcombine.low %v682_v44, %v696_v29  ;;  %v548_v50 = vrot.slane %v547_v37, 4  ;;  %v561_v52 = vor.u32 %v560_v42, %v557_v39  ;;  %v611_v40 = vshrl.u32 %v1635_v35, 16  ;;  %1006 = vmatpush1.bf16.msra.mxu0 %v1346_v48  ;;  %v486_v25 = vld [vmem:[#allocation2 + $0x34] sm:$0x1]  ;;  %v1681_v32 = vld [vmem:[#allocation2 + $0x10] sm:$0xf] }
  0x2d   : > { %v599_v54 = vrot.slane %v597_v33, 4  ;;  %v614_v55 = vshll.u32 %v1635_v35, 16  ;;  %v726_v58 = vshrl.u32 %v1638_v43, 16  ;;  %v602_v60 = vrot.slane %v600_v53, 5  ;;  %1007 = vmatprep.subr.bf16.mxu0 %v1374_v21 }
  0x2e   : > { %861 = vrot.lane.b32.xlu1 %v1240_v49, %s1376_s7  ;;  %v553_v59 = vsel %vm1617_vm6, %v548_v50, %v552_v38  ;;  %v562_v7 = vrot.slane %v561_v52, 4  ;;  %v729_v61 = vshll.u32 %v1638_v43, 16  ;;  %v613_v62 = vrot.slane %v611_v40, 4  ;;  %1298 = vmatpush1.bf16.msra.mxu1 %v1346_v48  ;;  %v531_v52 = vld [vmem:[#allocation2 + $0x14] sm:$0x1] }
  0x2f   : > { %v616_v4 = vrot.slane %v614_v55, 5  ;;  %v728_v5 = vrot.slane %v726_v58, 4  ;;  %v740_v12 = vshrl.u32 %v1646_v47, 16  ;;  %v603_v15 = vor.u32 %v602_v60, %v599_v54  ;;  %1289 = vmatprep.subr.bf16.mxu1 %v1374_v21  ;;  %v1349_v58 = vld [vmem:[%s1830_s4 + $0x40] sm:$0xff]  }
  0x30   : > { %v567_v14 = vsel %vm1617_vm6, %v562_v7, %v566_v1  ;;  %v731_v16 = vrot.slane %v729_v61, 5  ;;  %v743_v8 = vshll.u32 %v1646_v47, 16  ;;  %v718_v17 = vor.u32 %v1611_v9, %v1601_v57  ;;  %v533_v22 = vld [vmem:[#allocation2 + $0x24] sm:$0x1]  ;;  %1008 = vmatpush1.bf16.msra.mxu0 %v1347_v13  ;;  %v474_v1 = vld [vmem:[#allocation2 + $0x1c] sm:$0x1] }
  0x31   : > { %v1673_v18 = vrot.slane %v701_v3, 5  ;;  %v1232_v19 = vcombine.low %v553_v59, %v567_v14  ;;  %v617_v23 = vor.u32 %v616_v4, %v613_v62  ;;  %v604_v26 = vrot.slane %v603_v15, 4  ;;  %1021 = vmatprep.subr.bf16.mxu0 %v1374_v21  ;;  %v1721_v62 = vld [vmem:[#allocation2 + $0x30] sm:$0xf] }
  0x32   : > { %v606_v0 = vshll.u32 %v533_v22, 16  ;;  %v1676_v29 = vrot.slane %v740_v12, 4  ;;  %v1276_v31 = vpack.c.bf16 %v390_v41, %v390_v41  ;;  %v534_v3 = vld [vmem:[#allocation2 + $0x2c] sm:$0x1]  ;;  %v1687_v57 = vrot.slane %v743_v8, 5  ;;  %1299 = vmatpush1.bf16.msra.mxu1 %v1347_v13 }
  0x33   : > { %813 = vrot.lane.b32.xlu0 %v1232_v19, %s1377_s12  ;;  %v1238_v9 = vcombine.low %v1638_v43, %v1646_v47  ;;  %v665_v37 = vld [vmem:[#allocation2 + $0x2c] sm:$0x1]  ;;  %v732_v38 = vor.u32 %v731_v16, %v728_v5  ;;  %v384_v24 = vmax.f32 %v1572_v2, 0.0  ;;  %v618_v39 = vrot.slane %v617_v23, 4  ;;  %v1697_v47 = vld [vmem:[#allocation2 + $0x18] sm:$0xf]  ;;  %1290 = vmatprep.subr.bf16.mxu1 %v1374_v21 }
  0x34   : > { %v608_v41 = vrot.slane %v606_v0, 5  ;;  %v620_v42 = vshll.u32 %v534_v3, 16  ;;  %v487_v44 = vsel %vm1498_vm3, %v1276_v31, %v486_v25  ;;  %v704_v46 = vor.u32 %v1673_v18, %v1613_v10  ;;  %1022 = vmatpush2.bf16.msra.mxu0 %v1348_v30  ;;  %v664_v12 = vld [vmem:[#allocation2 + $0x24] sm:$0x1]  ;;  %v490_v18 = vld [vmem:[#allocation2 + $0x3c] sm:$0x1] }
  0x35   : > { %488 = vst [vmem:[#allocation2 + $0x34] sm:$0x1] %v487_v44  ;;  %v735_v43 = vshll.u32 %v665_v37, 16  ;;  %v1270_v33 = vpack.c.bf16 %v384_v24, %v384_v24  ;;  %v569_v2 = vshrl.u32 %v1681_v32, 16  ;;  %v1701_v48 = vrot.slane %v718_v17, 4  ;;  %1023 = vmatprep.subr.bf16.mxu0 %v1374_v21 }
  0x36   : > { %v609_v49 = vsel %vm1617_vm6, %v604_v26, %v608_v41  ;;  %v622_v50 = vrot.slane %v620_v42, 5  ;;  %v572_v53 = vshll.u32 %v1681_v32, 16  ;;  %v1707_v10 = vrot.slane %v732_v38, 4  ;;  %1300 = vmatpush2.bf16.msra.mxu1 %v1348_v30 }
  0x37   : > { %845 = vrot.lane.b32.xlu0 %v1238_v9, %s1375_s25  ;;  %v475_v54 = vsel %vm1498_vm3, %v1270_v33, %v474_v1  ;;  %v571_v40 = vrot.slane %v569_v2, 4  ;;  %v504_v55 = vadd.f32 %v1483_v20, %v1592_v51  ;;  %v746_v7 = vor.u32 %v1687_v57, %v1676_v29  ;;  %1291 = vmatprep.subr.bf16.mxu1 %v1374_v21 }
  0x38   : > { %v623_v59 = vsel %vm1617_vm6, %v618_v39, %v622_v50  ;;  %476 = vst [vmem:[#allocation2 + $0x1c] sm:$0x1] %v475_v54  ;;  %v574_v60 = vrot.slane %v572_v53, 5  ;;  %v583_v61 = vshrl.u32 %v1697_v47, 16  ;;  %v737_v51 = vrot.slane %v735_v43, 5  ;;  %1024 = vmatpush2.bf16.msra.mxu0 %v1349_v58 }
  0x39   : > { %v1234_v20 = vcombine.low %v609_v49, %v623_v59  ;;  %v578_v4 = vshll.u32 %v531_v52, 16  ;;  %v586_v5 = vshll.u32 %v1697_v47, 16  ;;  %v391_v15 = vmax.f32 %v1575_v36, 0.0 }
  0x3a   : > { %v575_v13 = vor.u32 %v574_v60, %v571_v40  ;;  %v585_v14 = vrot.slane %v583_v61, 4  ;;  %v392_v16 = vmax.f32 %v1585_v45, 0.0  ;;  %v1728_v8 = vrot.slane %v704_v46, 4  ;;  %1301 = vmatpush2.bf16.msra.mxu1 %v1349_v58 }
  0x3b   : > { %817 = vrot.lane.b32.xlu1 %v1234_v20, %s1377_s12  ;;  %v588_v17 = vrot.slane %v586_v5, 5  ;;  %v625_v19 = vshrl.u32 %v1721_v62, 16  ;;  %v628_v22 = vshll.u32 %v1721_v62, 16  ;;  %v721_v25 = vshll.u32 %v664_v12, 16 }
  0x3c   : > { %v666_v23 = vld [vmem:[#allocation2 + $0x34] sm:$0x1]  ;;  %v1277_v21 = vpack.c.bf16 %v391_v15, %v391_v15  ;;  %v1278_v26 = vpack.c.bf16 %v392_v16, %v392_v16  ;;  %v506_v0 = vmax.f32 %v504_v55, 0.0  ;;  %v738_v36 = vsel %vm1617_vm6, %v1707_v10, %v737_v51 }
  0x3d   : > { %v747_v45 = vrot.slane %v746_v7, 4  ;;  %v749_v29 = vshll.u32 %v666_v23, 16  ;;  %v589_v31 = vor.u32 %v588_v17, %v585_v14  ;;  %v576_v30 = vrot.slane %v575_v13, 4  ;;  %v535_v9 = vld [vmem:[#allocation2 + $0x34] sm:$0x1] }
  0x3e   : > { %v580_v3 = vrot.slane %v578_v4, 5  ;;  %489 = vst.msk [vmem:[#allocation2 + $0x38] sm:$0xf] %vm457_vm0, %v1277_v21  ;;  %v491_v57 = vsel %vm1498_vm3, %v1278_v26, %v490_v18  ;;  %v627_v37 = vrot.slane %v625_v19, 4  ;;  %v630_v39 = vrot.slane %v628_v22, 5 }
  0x3f   : > { %v751_v38 = vrot.slane %v749_v29, 5  ;;  %v532_v24 = vld [vmem:[#allocation2 + $0x1c] sm:$0x1]  ;;  %492 = vst [vmem:[#allocation2 + $0x3c] sm:$0x1] %v491_v57  ;;  %v1279_v42 = vpack.c.bf16 %v506_v0, %v506_v0  ;;  %v505_v44 = vadd.f32 %v1562_v28, %v1608_v6  ;;  %v590_v1 = vrot.slane %v589_v31, 4 }
  0x40   : > { %v663_v41 = vld [vmem:[#allocation2 + $0x1c] sm:$0x1]  ;;  %v592_v46 = vshll.u32 %v532_v24, 16  ;;  %v723_v33 = vrot.slane %v721_v25, 5  ;;  %v634_v49 = vshll.u32 %v535_v9, 16  ;;  %v1228_v52 = vcombine.low %v1599_v56, %v1604_v63 }
  0x41   : > { %v707_v43 = vshll.u32 %v663_v41, 16  ;;  %v752_v2 = vsel %vm1617_vm6, %v747_v45, %v751_v38  ;;  %517 = vst.msk [vmem:[#allocation2 + $0x40] sm:$0xf] %vm457_vm0, %v1279_v42  ;;  %v507_v50 = vmax.f32 %v505_v44, 0.0  ;;  %v581_v10 = vsel %vm1617_vm6, %v576_v30, %v580_v3  ;;  %v518_v6 = vld [vmem:[#allocation2 + $0x44] sm:$0x1] }
  0x42   : > { %v1242_v53 = vcombine.low %v738_v36, %v752_v2  ;;  %v594_v54 = vrot.slane %v592_v46, 5  ;;  %v631_v40 = vor.u32 %v630_v39, %v627_v37  ;;  %v1230_v58 = vcombine.low %v1627_v27, %v1635_v35 }
  0x43   : > { %v709_v28 = vrot.slane %v707_v43, 5  ;;  %v1280_v55 = vpack.c.bf16 %v507_v50, %v507_v50  ;;  %v724_v60 = vsel %vm1617_vm6, %v1701_v48, %v723_v33  ;;  %v636_v51 = vrot.slane %v634_v49, 5 }
  0x44   : > { %865 = vrot.lane.b32.xlu1 %v1242_v53, %s1376_s7  ;;  %v595_v59 = vsel %vm1617_vm6, %v590_v1, %v594_v54  ;;  %v1229_v12 = vcombine.low %v1681_v32, %v1697_v47  ;;  %v632_v17 = vrot.slane %v631_v40, 4  ;;  %vm882_vm9 = vcmask 654336  }
  0x45   : > { %v710_v7 = vsel %vm1617_vm6, %v1728_v8, %v709_v28  ;;  %v1233_v61 = vcombine.low %v581_v10, %v595_v59  ;;  %v1759_v20 = vld [vmem:[#allocation2 + $0x38] sm:$0xf]  ;;  %v519_v5 = vsel %vm1498_vm3, %v1280_v55, %v518_v6  ;;  %vm891_vm10 = vcmask 982016  }
  0x46   : > { %v659_v4 = vld [vmem:[#allocation2 + $0x38] sm:$0xf]  ;;  %v536_v13 = vld [vmem:[#allocation2 + $0x3c] sm:$0x1]  ;;  %v639_v14 = vshrl.u32 %v1759_v20, 16  ;;  %v642_v15 = vshll.u32 %v1759_v20, 16  ;;  %v1241_v48 = vcombine.low %v710_v7, %v724_v60  ;;  %v1231_v34 = vcombine.low %v1721_v62, %v1759_v20 }
  0x47   : > { %v754_v16 = vshrl.u32 %v659_v4, 16  ;;  %v757_v8 = vshll.u32 %v659_v4, 16  ;;  %520 = vst [vmem:[#allocation2 + $0x44] sm:$0x1] %v519_v5  ;;  %815 = vrot.lane.b32.xlu0 %v1233_v61, %s1377_s12  ;;  %v648_v18 = vshll.u32 %v536_v13, 16  ;;  %v637_v37 = vsel %vm1617_vm6, %v632_v17, %v636_v51 }
  0x48   : > { %v667_v19 = vld [vmem:[#allocation2 + $0x3c] sm:$0x1]  ;;  %v641_v22 = vrot.slane %v639_v14, 4  ;;  %v644_v23 = vrot.slane %v642_v15, 5  ;;  %v660_v25 = vld [vmem:[#allocation2 + $0x40] sm:$0xf] }
  0x49   : > { %v756_v21 = vrot.slane %v754_v16, 4  ;;  %v759_v26 = vrot.slane %v757_v8, 5  ;;  %v768_v0 = vshrl.u32 %v660_v25, 16  ;;  %v771_v36 = vshll.u32 %v660_v25, 16 }
  0x4a   : > { %v645_v45 = vor.u32 %v644_v23, %v641_v22  ;;  %v650_v29 = vrot.slane %v648_v18, 5  ;;  %v763_v30 = vshll.u32 %v667_v19, 16  ;;  %v1239_v9 = vcombine.low %v659_v4, %v660_v25 }
  0x4b   : > { %v760_v31 = vor.u32 %v759_v26, %v756_v21  ;;  %863 = vrot.lane.b32.xlu0 %v1241_v48, %s1376_s7  ;;  %v770_v3 = vrot.slane %v768_v0, 4  ;;  %v773_v57 = vrot.slane %v771_v36, 5  ;;  %vm1086_vm11 = vcmask 130048  }
  0x4c   : > { %v646_v38 = vrot.slane %v645_v45, 4  ;;  %v765_v41 = vrot.slane %v763_v30, 5  ;;  %vm1089_vm12 = vcmask 392192   ;;  %vm1091_vm13 = vcmask 523264  }
  0x4d   : > { %v761_v24 = vrot.slane %v760_v31, 4  ;;  %v774_v42 = vor.u32 %v773_v57, %v770_v3  ;;  %vm1094_vm14 = vcmask 785408   ;;  %vm1096_vm15 = vcmask 916480  }
  0x4e   : > { %v668_v39 = vld [vmem:[#allocation2 + $0x44] sm:$0x1]  ;;  %v651_v44 = vsel %vm1617_vm6, %v646_v38, %v650_v29 }
  0x4f   : > { %v777_v1 = vshll.u32 %v668_v39, 16  ;;  %v1235_v46 = vcombine.low %v637_v37, %v651_v44  ;;  %847 = vrot.lane.b32.xlu0 %v1239_v9, %s1375_s25  ;;  %v775_v43 = vrot.slane %v774_v42, 4  ;;  %v766_v33 = vsel %vm1617_vm6, %v761_v24, %v765_v41 }
  0x51   : > { %v779_v2 = vrot.slane %v777_v1, 5  ;;  %819 = vrot.lane.b32.xlu1 %v1235_v46, %s1377_s12 }
  0x53   : > { %v780_v49 = vsel %vm1617_vm6, %v775_v43, %v779_v2 }
  0x54   : > { %v1243_v50 = vcombine.low %v766_v33, %v780_v49 }
  0x56   : > { %867 = vrot.lane.b32.xlu1 %v1243_v50, %s1376_s7 }
  0x94   : > { %v844_v53 = vpop.permute.xlu1 %843 }
  0x95   : > { %v842_v10 = vpop.permute.xlu0 %841 }
  0xa0   : > { %v862_v54 = vpop.permute.xlu1 %861 }
  0xa1   : > { %1254 = vmatprep.mubr.msk.bf16.mxu0 %vm984_vm7, %v862_v54 }
  0xa5   : > { %v814_v28 = vpop.permute.xlu0 %813 }
  0xa6   : > { %v872_v6 = vsel %vm869_vm8, %v1228_v52, %v814_v28 }
  0xa7   : > { %v884_v11 = vsel %vm882_vm9, %v872_v6, %v842_v10 }
  0xa8   : > { %v893_v40 = vsel %vm891_vm10, %v884_v11, %v862_v54 }
  0xa9   : > { %1026 = vmatmul.mubr.bf16.vlgmr.msra.gmra.mxu0 %v893_v40  ;;  %v846_v7 = vpop.permute.xlu0 %845 }
  0xad   : > { %v818_v55 = vpop.permute.xlu1 %817 }
  0xae   : > { %v878_v59 = vsel %vm869_vm8, %v1230_v58, %v818_v55 }
  0xaf   : > { %v888_v60 = vsel %vm882_vm9, %v878_v59, %v846_v7 }
  0xb6   : > { %v866_v61 = vpop.permute.xlu1 %865 }
  0xb7   : > { %1256 = vmatprep.mubr.msk.bf16.mxu1 %vm984_vm7, %v866_v61  ;;  %v899_v56 = vsel %vm891_vm10, %v888_v60, %v866_v61 }
  0xb8   : > { %1042 = vmatmul.mubr.bf16.vlgmr.msra.gmra.mxu1 %v899_v56 }
  0xb9   : > { %v816_v63 = vpop.permute.xlu0 %815 }
  0xba   : > { %v875_v52 = vsel %vm869_vm8, %v1229_v12, %v816_v63 }
  0xbb   : > { %v886_v27 = vsel %vm882_vm9, %v875_v52, %v844_v53 }
  0xbd   : > { %v864_v51 = vpop.permute.xlu0 %863 }
  0xbe   : > { %1255 = vmatprep.mubr.msk.bf16.mxu0 %vm984_vm7, %v864_v51  ;;  %v896_v35 = vsel %vm891_vm10, %v886_v27, %v864_v51 }
  0xbf   : > { %1034 = vmatmul.mubr.bf16.gmra.mxu0 %v896_v35 }
  0xc1   : > { %v848_v58 = vpop.permute.xlu0 %847 }
  0xc3   : > { %v820_v4 = vpop.permute.xlu1 %819 }
  0xc4   : > { %v881_v5 = vsel %vm869_vm8, %v1231_v34, %v820_v4 }
  0xc5   : > { %v890_v13 = vsel %vm882_vm9, %v881_v5, %v848_v58 }
  0xc8   : > { %v868_v32 = vpop.permute.xlu1 %867 }
  0xc9   : > { %1257 = vmatprep.mubr.msk.bf16.mxu1 %vm984_vm7, %v868_v32  ;;  %v902_v47 = vsel %vm891_vm10, %v890_v13, %v868_v32 }
  0xca   : > { %1050 = vmatmul.mubr.bf16.gmra.mxu1 %v902_v47 }
 0x169   : > { %v1027_v12 = vpop.f32.mrf.mxu0 }
 0x16b   : > { %v1029_v14 = vpop.f32.mrf.mxu0 }
 0x16d   : > { %v1030_v15 = vpop.f32.mrf.mxu0 }
 0x16e   : > { %1059 = vrot.lane.b32.xlu0 %v1030_v15, %s1378_s15 }
 0x16f   : > { %v1032_v16 = vpop.f32.mrf.mxu0 }
 0x178   : > { %v1043_v8 = vpop.f32.mrf.mxu1 }
 0x179   : > { %1071 = vrot.lane.b32.xlu1 %v1043_v8, %s1379_s16 }
 0x17a   : > { %v1045_v62 = vpop.f32.mrf.mxu1 }
 0x17c   : > { %v1046_v20 = vpop.f32.mrf.mxu1 }
 0x17d   : > { %1075 = vrot.lane.b32.xlu0 %v1046_v20, %s1375_s25  ;;  %s1209_s25 = sshll.u32 %s1841_s18, 3 }
 0x17e   : > { %v1048_v48 = vpop.f32.mrf.mxu1  ;;  %s323_s28 = scalar_lea.vmem %s1831_s5, %s1209_s25 }
 0x17f   : > { %v1035_v17 = vpop.f32.mrf.mxu0 }
 0x180   : > { %1063 = vrot.lane.b32.xlu1 %v1035_v17, %s1380_s17 }
 0x181   : > { %v1037_v18 = vpop.f32.mrf.mxu0 }
 0x183   : > { %v1038_v19 = vpop.f32.mrf.mxu0 }
 0x184   : > { %1067 = vrot.lane.b32.xlu0 %v1038_v19, %s1381_s22 }
 0x185   : > { %v1040_v34 = vpop.f32.mrf.mxu0 }
 0x18a   : > { %v1051_v22 = vpop.f32.mrf.mxu1 }
 0x18b   : > { %1079 = vrot.lane.b32.xlu1 %v1051_v22, %s1382_s23 }
 0x18c   : > { %v1053_v23 = vpop.f32.mrf.mxu1 }
 0x18e   : > { %v1054_v25 = vpop.f32.mrf.mxu1 }
 0x18f   : > { %1083 = vrot.lane.b32.xlu0 %v1054_v25, %s1383_s24 }
 0x190   : > { %v1056_v21 = vpop.f32.mrf.mxu1 }
 0x1e0   : > { %v1060_v26 = vpop.permute.xlu0 %1059 }
 0x1e1   : > { %v1087_v29 = vsel %vm1086_vm11, %v1027_v12, %v1060_v26 }
 0x1eb   : > { %v1072_v0 = vpop.permute.xlu1 %1071 }
 0x1ef   : > { %v1076_v36 = vpop.permute.xlu0 %1075 }
 0x1f2   : > { %v1064_v45 = vpop.permute.xlu1 %1063 }
 0x1f3   : > { %v1088_v31 = vsel %vm984_vm7, %v1087_v29, %v1064_v45 }
 0x1f6   : > { %v1068_v30 = vpop.permute.xlu0 %1067 }
 0x1f7   : > { %v1090_v3 = vsel %vm1089_vm12, %v1088_v31, %v1068_v30 }
 0x1f8   : > { %v1092_v57 = vsel %vm1091_vm13, %v1090_v3, %v1072_v0 }
 0x1f9   : > { %v1093_v9 = vsel %vm882_vm9, %v1092_v57, %v1076_v36 }
 0x1fd   : > { %v1080_v37 = vpop.permute.xlu1 %1079 }
 0x1fe   : > { %v1095_v38 = vsel %vm1094_vm14, %v1093_v9, %v1080_v37 }
 0x201   : > { %v1084_v24 = vpop.permute.xlu0 %1083 }
 0x202   : > { %v1097_v41 = vsel %vm1096_vm15, %v1095_v38, %v1084_v24 }
 0x203   : > { %1098 = vst [vmem:[%s323_s28] sm:$0xff] %v1097_v41 }
 0x204 PF: > { %s15_s20 = sadd.s32 1, %s1372_s20   ;;  %s1836_s18 = smov %s1368_s19 }
 0x205   : > { %p12_p5 = scmp.ge.s32.totalorder %s15_s20, 4   ;;  %s1837_s19 = smov %s1839_s21 }
 0x207   :  { %14 = sbr.rel (!%p12_p5) target bundleno = 2 (0x2), region = 75 }

</bundles_post_ra>
